<compile_context>
chip_gen: v6e
topology: v6e:2x2x1
jax: 0.10.0
libtpu: 0.0.40
codegen_flags: <defaults>
</compile_context>

<pallas_src>
import functools

import jax
import jax.numpy as jnp
from jax.experimental import pallas as pl
from jax.experimental.pallas import tpu as pltpu


def convlstm_cell_kernel(patch_ref, c_ref, w_ref, b_ref,
                         h_out_ref, c_out_ref, *, hidden):
    """One batch element per grid step.

    patch_ref : (KKCc_pad, HW)  bf16  im2col patch (contraction dim x spatial)
    c_ref     : (Ch, HW)              current cell state
    w_ref     : (4*Ch, KKCc_pad) bf16 repacked conv weights
    b_ref     : (4*Ch, 1)  f32        conv bias (broadcast over lanes)
    outputs   : (Ch, HW) each         h_next, c_next
    """
    Ch = hidden

    # Single fused conv-as-matmul on the MXU, f32 accumulation.
    acc = jnp.dot(w_ref[...], patch_ref[...],
                  preferred_element_type=jnp.float32)          # (4Ch, HW)
    acc = acc + b_ref[...].astype(jnp.float32)                 # lane broadcast

    # Gate splits are sublane-aligned row slices (Ch is a multiple of 8 here).
    cc_i = acc[0 * Ch:1 * Ch, :]
    cc_f = acc[1 * Ch:2 * Ch, :]
    cc_o = acc[2 * Ch:3 * Ch, :]
    cc_g = acc[3 * Ch:4 * Ch, :]

    i = jax.nn.sigmoid(cc_i)
    f = jax.nn.sigmoid(cc_f)
    o = jax.nn.sigmoid(cc_o)
    g = jnp.tanh(cc_g)

    c_cur = c_ref[...].astype(jnp.float32)                     # (Ch, HW)
    c_next = f * c_cur + i * g
    h_next = o * jnp.tanh(c_next)

    h_out_ref[...] = h_next.astype(h_out_ref.dtype)
    c_out_ref[...] = c_next.astype(c_out_ref.dtype)


def convlstm_cell(x_nchw, h_nchw, c_nchw, weight_oihw, bias, *, kernel_size):
    """ConvLSTMCell.forward.  Inputs/outputs follow the PyTorch NCHW convention."""
    K = kernel_size
    pad = K // 2                      # matches PyTorch padding (odd K => 'same')
    B, Cin, H, W = x_nchw.shape
    Ch = h_nchw.shape[1]
    Cc = Cin + Ch
    HW = H * W
    KKCc = K * K * Cc
    KKCc_pad = ((KKCc + 15) // 16) * 16   # pad contraction dim for bf16 packing
    dtype = x_nchw.dtype

    # --- wrapper glue: im2col + weight repack (plain JAX, no transposes of outputs) ---
    combined = jnp.concatenate([x_nchw, h_nchw], axis=1)                 # (B,Cc,H,W)
    comb_pad = jnp.pad(combined, ((0, 0), (0, 0), (pad, pad), (pad, pad)))
    taps = [comb_pad[:, :, dy:dy + H, dx:dx + W]
            for dy in range(K) for dx in range(K)]                       # K*K x (B,Cc,H,W)
    patches = jnp.stack(taps, axis=1).reshape(B, KKCc, HW)               # (B,KKCc,HW)
    if KKCc_pad > KKCc:
        patches = jnp.pad(patches, ((0, 0), (0, KKCc_pad - KKCc), (0, 0)))
    patches = patches.astype(jnp.bfloat16)

    # (O, I, kh, kw) -> (O, kh, kw, I) -> (4Ch, K*K*Cc); column order matches patches.
    w_mat = jnp.transpose(weight_oihw, (0, 2, 3, 1)).reshape(4 * Ch, KKCc)
    if KKCc_pad > KKCc:
        w_mat = jnp.pad(w_mat, ((0, 0), (0, KKCc_pad - KKCc)))
    w_mat = w_mat.astype(jnp.bfloat16)

    bias_col = bias.reshape(4 * Ch, 1).astype(jnp.float32)
    c_flat = c_nchw.reshape(B, Ch, HW)                                   # reshape, no transpose

    kernel = functools.partial(convlstm_cell_kernel, hidden=Ch)

    h_flat, c_next_flat = pl.pallas_call(
        kernel,
        out_shape=(jax.ShapeDtypeStruct((B, Ch, HW), dtype),
                   jax.ShapeDtypeStruct((B, Ch, HW), dtype)),
        grid=(B,),
        in_specs=[
            pl.BlockSpec((None, KKCc_pad, HW), lambda b: (b, 0, 0)),
            pl.BlockSpec((None, Ch, HW), lambda b: (b, 0, 0)),
            pl.BlockSpec((4 * Ch, KKCc_pad), lambda b: (0, 0)),
            pl.BlockSpec((4 * Ch, 1), lambda b: (0, 0)),
        ],
        out_specs=(
            pl.BlockSpec((None, Ch, HW), lambda b: (b, 0, 0)),
            pl.BlockSpec((None, Ch, HW), lambda b: (b, 0, 0)),
        ),
        compiler_params=pltpu.CompilerParams(
            dimension_semantics=("parallel",)),
    )(patches, c_flat, w_mat, bias_col)

    # (B, Ch, HW) -> (B, Ch, H, W): a pure reshape, no transpose.
    return h_flat.reshape(B, Ch, H, W), c_next_flat.reshape(B, Ch, H, W)


def _reference_convlstm(x, h, c, weight, bias, kernel_size):
    """Pure-JAX reference matching the PyTorch forward (NCHW, f32)."""
    pad = kernel_size // 2
    combined = jnp.concatenate([x, h], axis=1)
    conv = jax.lax.conv_general_dilated(
        combined, weight, window_strides=(1, 1),
        padding=((pad, pad), (pad, pad)),
        dimension_numbers=("NCHW", "OIHW", "NCHW"))
    conv = conv + bias[None, :, None, None]
    cc_i, cc_f, cc_o, cc_g = jnp.split(conv, 4, axis=1)
    i = jax.nn.sigmoid(cc_i)
    f = jax.nn.sigmoid(cc_f)
    o = jax.nn.sigmoid(cc_o)
    g = jnp.tanh(cc_g)
    c_next = f * c + i * g
    h_next = o * jnp.tanh(c_next)
    return h_next, c_next


if __name__ == "__main__":
    B, Cin, Ch, H, W, K = 2, 4, 8, 16, 16, 3

    key = jax.random.PRNGKey(0)
    k1, k2, k3, k4, k5 = jax.random.split(key, 5)

    x = jax.random.normal(k1, (B, Cin, H, W), dtype=jnp.float32)
    h = jax.random.normal(k2, (B, Ch, H, W), dtype=jnp.float32)
    c = jax.random.normal(k3, (B, Ch, H, W), dtype=jnp.float32)

    # Deterministic Conv2d-like init: uniform(-1/sqrt(fan_in), 1/sqrt(fan_in))
    fan_in = (Cin + Ch) * K * K
    bound = 1.0 / float(fan_in) ** 0.5
    weight = jax.random.uniform(k4, (4 * Ch, Cin + Ch, K, K),
                                dtype=jnp.float32, minval=-bound, maxval=bound)
    bias = jax.random.uniform(k5, (4 * Ch,), dtype=jnp.float32,
                              minval=-bound, maxval=bound)

    h_next, c_next = convlstm_cell(x, h, c, weight, bias, kernel_size=K)
    jax.block_until_ready((h_next, c_next))

    h_ref, c_ref = _reference_convlstm(x, h, c, weight, bias, K)
    assert h_next.shape == (B, Ch, H, W) and c_next.shape == (B, Ch, H, W)
    # Tolerances loosened vs. the f32 reference because the conv runs on the
    # MXU with bf16 operands (f32 accumulation); gate math stays f32.
    assert jnp.allclose(h_next, h_ref, rtol=2e-2, atol=2e-2)
    assert jnp.allclose(c_next, c_ref, rtol=2e-2, atol=2e-2)

    print("KERNEL_OK")
</pallas_src>

<mosaic_0001>
module attributes {stable_mosaic.version = 11 : i64} {
  func.func @convlstm_cell_kernel(%arg0: i32, %arg1: memref<1x112x256xbf16, #tpu.memory_space<vmem>>, %arg2: memref<1x8x256xf32, #tpu.memory_space<vmem>>, %arg3: memref<32x112xbf16, #tpu.memory_space<vmem>>, %arg4: memref<32x1xf32, #tpu.memory_space<vmem>>, %arg5: memref<1x8x256xf32, #tpu.memory_space<vmem>>, %arg6: memref<1x8x256xf32, #tpu.memory_space<vmem>>) attributes {dimension_semantics = [#tpu.dimension_semantics<parallel>], iteration_bounds = array<i64: 2>, scalar_prefetch = 0 : i64, scratch_operands = 0 : i64, tpu.core_type = #tpu.core_type<tc>, window_params = [{transform_indices = @transform_0, window_bounds = array<i64: 1, 112, 256>}, {transform_indices = @transform_1, window_bounds = array<i64: 1, 8, 256>}, {pipeline_mode = #tpu.pipeline_mode<synchronous>, transform_indices = @transform_2, window_bounds = array<i64: 32, 112>}, {pipeline_mode = #tpu.pipeline_mode<synchronous>, transform_indices = @transform_3, window_bounds = array<i64: 32, 1>}, {transform_indices = @transform_4, window_bounds = array<i64: 1, 8, 256>}, {transform_indices = @transform_5, window_bounds = array<i64: 1, 8, 256>}]} {
    %c0 = arith.constant 0 : index
    %c0_0 = arith.constant 0 : index
    %0 = vector.load %arg3[%c0, %c0_0] : memref<32x112xbf16, #tpu.memory_space<vmem>>, vector<32x112xbf16>
    %c0_1 = arith.constant 0 : index
    %c0_2 = arith.constant 0 : index
    %c0_3 = arith.constant 0 : index
    %1 = vector.load %arg1[%c0_1, %c0_2, %c0_3] : memref<1x112x256xbf16, #tpu.memory_space<vmem>>, vector<1x112x256xbf16>
    %2 = vector.shape_cast %1 : vector<1x112x256xbf16> to vector<112x256xbf16>
    %cst = arith.constant dense<0.000000e+00> : vector<32x256xf32>
    %3 = tpu.matmul %0, %2, %cst {dimension_numbers = #tpu.dot_dimension_numbers<[1], [0], [0], [1], [0, 0, 1, 1], [], []>} : vector<32x112xbf16>, vector<112x256xbf16>, vector<32x256xf32> -> vector<32x256xf32>
    %c0_4 = arith.constant 0 : index
    %c0_5 = arith.constant 0 : index
    %4 = vector.load %arg4[%c0_4, %c0_5] : memref<32x1xf32, #tpu.memory_space<vmem>>, vector<32x1xf32>
    %5 = vector.broadcast %4 : vector<32x1xf32> to vector<32x256xf32>
    %6 = arith.addf %3, %5 : vector<32x256xf32>
    %7 = vector.extract_strided_slice %6 {offsets = [0, 0], sizes = [8, 256], strides = [1, 1]} : vector<32x256xf32> to vector<8x256xf32>
    %8 = vector.extract_strided_slice %6 {offsets = [8, 0], sizes = [8, 256], strides = [1, 1]} : vector<32x256xf32> to vector<8x256xf32>
    %9 = vector.extract_strided_slice %6 {offsets = [16, 0], sizes = [8, 256], strides = [1, 1]} : vector<32x256xf32> to vector<8x256xf32>
    %10 = vector.extract_strided_slice %6 {offsets = [24, 0], sizes = [8, 256], strides = [1, 1]} : vector<32x256xf32> to vector<8x256xf32>
    %11 = arith.negf %7 : vector<8x256xf32>
    %12 = math.exp %11 : vector<8x256xf32>
    %cst_6 = arith.constant 1.000000e+00 : f32
    %13 = vector.broadcast %cst_6 : f32 to vector<8x256xf32>
    %14 = arith.addf %13, %12 : vector<8x256xf32>
    %15 = arith.divf %13, %14 : vector<8x256xf32>
    %16 = arith.negf %8 : vector<8x256xf32>
    %17 = math.exp %16 : vector<8x256xf32>
    %cst_7 = arith.constant 1.000000e+00 : f32
    %18 = vector.broadcast %cst_7 : f32 to vector<8x256xf32>
    %19 = arith.addf %18, %17 : vector<8x256xf32>
    %20 = arith.divf %18, %19 : vector<8x256xf32>
    %21 = arith.negf %9 : vector<8x256xf32>
    %22 = math.exp %21 : vector<8x256xf32>
    %cst_8 = arith.constant 1.000000e+00 : f32
    %23 = vector.broadcast %cst_8 : f32 to vector<8x256xf32>
    %24 = arith.addf %23, %22 : vector<8x256xf32>
    %25 = arith.divf %23, %24 : vector<8x256xf32>
    %26 = math.tanh %10 : vector<8x256xf32>
    %c0_9 = arith.constant 0 : index
    %c0_10 = arith.constant 0 : index
    %c0_11 = arith.constant 0 : index
    %27 = vector.load %arg2[%c0_9, %c0_10, %c0_11] : memref<1x8x256xf32, #tpu.memory_space<vmem>>, vector<1x8x256xf32>
    %28 = vector.shape_cast %27 : vector<1x8x256xf32> to vector<8x256xf32>
    %29 = arith.mulf %20, %28 : vector<8x256xf32>
    %30 = arith.mulf %15, %26 : vector<8x256xf32>
    %31 = arith.addf %29, %30 : vector<8x256xf32>
    %32 = math.tanh %31 : vector<8x256xf32>
    %33 = arith.mulf %25, %32 : vector<8x256xf32>
    %c0_12 = arith.constant 0 : index
    %c0_13 = arith.constant 0 : index
    %c0_14 = arith.constant 0 : index
    %34 = vector.load %arg5[%c0_12, %c0_13, %c0_14] : memref<1x8x256xf32, #tpu.memory_space<vmem>>, vector<1x8x256xf32>
    %35 = vector.shape_cast %34 : vector<1x8x256xf32> to vector<8x256xf32>
    %36 = vector.shape_cast %33 : vector<8x256xf32> to vector<1x8x256xf32>
    tpu.vector_store %arg5[%c0_12, %c0_13, %c0_14], %36 {strides = array<i32>} : memref<1x8x256xf32, #tpu.memory_space<vmem>>, vector<1x8x256xf32>,
    %c0_15 = arith.constant 0 : index
    %c0_16 = arith.constant 0 : index
    %c0_17 = arith.constant 0 : index
    %37 = vector.load %arg6[%c0_15, %c0_16, %c0_17] : memref<1x8x256xf32, #tpu.memory_space<vmem>>, vector<1x8x256xf32>
    %38 = vector.shape_cast %37 : vector<1x8x256xf32> to vector<8x256xf32>
    %39 = vector.shape_cast %31 : vector<8x256xf32> to vector<1x8x256xf32>
    tpu.vector_store %arg6[%c0_15, %c0_16, %c0_17], %39 {strides = array<i32>} : memref<1x8x256xf32, #tpu.memory_space<vmem>>, vector<1x8x256xf32>,
    return
  }
  func.func @transform_0(%arg0: i32) -> (i32, i32, i32) {
    %c0_i32 = arith.constant 0 : i32
    %c0_i32_0 = arith.constant 0 : i32
    %c0_i32_1 = arith.constant 0 : i32
    return %arg0, %c0_i32, %c0_i32_0 : i32, i32, i32
  }
  func.func @transform_1(%arg0: i32) -> (i32, i32, i32) {
    %c0_i32 = arith.constant 0 : i32
    %c0_i32_0 = arith.constant 0 : i32
    %c0_i32_1 = arith.constant 0 : i32
    return %arg0, %c0_i32, %c0_i32_0 : i32, i32, i32
  }
  func.func @transform_2(%arg0: i32) -> (i32, i32) {
    %c0_i32 = arith.constant 0 : i32
    %c0_i32_0 = arith.constant 0 : i32
    %c0_i32_1 = arith.constant 0 : i32
    return %c0_i32, %c0_i32_0 : i32, i32
  }
  func.func @transform_3(%arg0: i32) -> (i32, i32) {
    %c0_i32 = arith.constant 0 : i32
    %c0_i32_0 = arith.constant 0 : i32
    %c0_i32_1 = arith.constant 0 : i32
    return %c0_i32, %c0_i32_0 : i32, i32
  }
  func.func @transform_4(%arg0: i32) -> (i32, i32, i32) {
    %c0_i32 = arith.constant 0 : i32
    %c0_i32_0 = arith.constant 0 : i32
    %c0_i32_1 = arith.constant 0 : i32
    return %arg0, %c0_i32, %c0_i32_0 : i32, i32, i32
  }
  func.func @transform_5(%arg0: i32) -> (i32, i32, i32) {
    %c0_i32 = arith.constant 0 : i32
    %c0_i32_0 = arith.constant 0 : i32
    %c0_i32_1 = arith.constant 0 : i32
    return %arg0, %c0_i32, %c0_i32_0 : i32, i32, i32
  }
}

</mosaic_0001>

<bundles_post_ra>
// kernel: tpu_custom_call.1
= control target key start
LH: loop header
LB: loop body
LE: loop exit
PB: predicated region body
PF: predicated region fallthrough
CT: control target
= control target key end

     0   :  { %11 = vsyncpa [#allocation3], 0  ;;  %s1297_s0 = inlined_call_operand.hbm [shape: bf16[2,112,256], index: 0, kind: input, shape index: {}]   ;;  %s1298_s1 = inlined_call_operand.vmem [shape: f32[2,8,256], index: 1, kind: input, shape index: {}]   ;;  %s1299_s2 = inlined_call_operand.hbm [shape: bf16[32,112], index: 2, kind: input, shape index: {}]   ;;  %s1300_s3 = inlined_call_operand.vmem [shape: f32[32,1], index: 3, kind: input, shape index: {}]   ;;  %s1301_s4 = inlined_call_operand.hbm [shape: f32[2,8,256], index: 4, kind: output, shape index: {0}]   ;;  %s1302_s5 = inlined_call_operand.hbm [shape: f32[2,8,256], index: 5, kind: output, shape index: {1}]  }
   0x1   :  { %13 = vsyncpa [#allocation3 + $0x1], 0 }
   0x2   :  { %14 = vsyncpa [#allocation6], 0 }
   0x3   :  { %15 = vsyncpa [#allocation4], 0 }
   0x4   :  { %17 = vsyncpa [#allocation4 + $0x1], 0 }
   0x5   :  { %18 = vsyncpa [#allocation9], 0 }
   0x6   :  { %20 = vsyncpa [#allocation9 + $0x1], 0  ;;  %s1064_s18 = smov 0   ;;  %s1066_s19 = smov 0  }
   0x7   :  { %s1068_s20 = smov 0   ;;  %s1070_s21 = smov 0  }
   0x8 LB: > { %s1085_s22 = sadd.s32 4294967295, %s1023_s21   ;;  %s684_s23 = sadd.s32 4294967294, %s1023_s21   ;;  %s1023_s21 = sphi %s1070_s21, %s1324_s21   ;;  %s1019_s20 = sphi %s1068_s20, %s1323_s20   ;;  %s1015_s19 = sphi %s1066_s19, %s1322_s19   ;;  %s1011_s18 = sphi %s1064_s18, %s1321_s18  }
   0x9   : > { %p46_p0 = scmp.ne.s32.totalorder %s1015_s19, %s1011_s18  ;;  %p1303_p1 = scmp.eq.s32.totalorder %s1085_s22, 0 }
   0xa   : > { %p144_p3 = scmp.eq.s32.totalorder %s684_s23, 1  ;;  %p685_p5 = scmp.ge.s32.totalorder %s1023_s21, 1 }
   0xb   : > { %p1094_p4 = por %p1303_p1, %p46_p0  ;;  %p177_p7 = scmp.lt.s32.totalorder %s1023_s21, 3 }
   0xc   : > { %p1099_p6 = por %p144_p3, %p46_p0  ;;  %s1025_s27 = smov [#allocation5]  }
   0xd   : > { %s1307_s24 = scalar_select %p1094_p4, 1, 0 }
   0xe   : > { %s1308_s25 = scalar_select %p1099_p6, 1, 0 }
   0xf   : > { %p1104_p8 = pnand %p685_p5, %p177_p7  ;;  %s189_s28 = sshll.u32 %s1025_s27, 4  ;;  %s190_s28 = int_to_ptr.vmem [resolvable:$true] %s189_s28 }
  0x10   : > { %s1118_s30 = sadd.s32 1, %s1023_s21   ;;  %s33_s6 = sadd.s32 1, %s1019_s20 }
  0x11   : > { %s1309_s26 = scalar_select %p1104_p8, 1, 0 }
  0x12   : > { %p757_p9 = pneg %p1104_p8  ;;  %s30_s7 = ssub.s32 %s1023_s21, %s1118_s30 }
  0x13   : > { %s882_s8 = scalar_lea.vmem %s190_s28, 256  ;;  %p890_p5 = scmp.lt.s32.totalorder %s190_s28, %s190_s28 }
  0x14   : > { %p1113_p11 = pnand %p757_p9, %p1303_p1  ;;  %p883_p13 = scmp.ne.s32.totalorder %s190_s28, %s882_s8 }
  0x15   : > { %p891_p7 = scmp.lt.s32.totalorder %s882_s8, %s882_s8 }
  0x16   : > { %p873_p12 = pneg %p1113_p11 }
  0x17   : > { %p892_p10 = por %p891_p7, %p890_p5 }
  0x18   : > { %p885_p0 = pnand %p883_p13, %p873_p12 }
  0x1a   : > { %p886_p3 = pneg %p885_p0 }
  0x1c   : > { %p893_p2 = pnand %p892_p10, %p886_p3 }
  0x1e   : > { %896 = shalt.err (!%p893_p2)
}
  0x1f   : > { %s1026_s9 = smov 64   ;;  %s1027_s10 = smov 4  }
  0x20   : > { %760 = dma.hbm_to_vmem [thread:$0]  (!%p1113_p11), %s1299_s2, 256, %s190_s28, [#allocation6], %s1026_s9, %s1026_s9, %s1027_s10  }
  0x21   : > { %p31_p9 = scmp.eq.s32.totalorder %s30_s7, 0  ;;  %p40_p12 = scmp.ne.s32.totalorder %s1019_s20, %s1015_s19 }
  0x22   : > { %p41_p10 = scmp.eq.s32.totalorder %s1023_s21, 0  ;;  %p773_p2 = scmp.lt.s32.totalorder %s1023_s21, 2 }
  0x23   : > { %s1135_s13 = scalar_select %p31_p9, %s1019_s20, %s33_s6  }
  0x24   : > { %p42_p13 = por %p41_p10, %p40_p12  ;;  %p1311_p0 = scmp.eq.s32.totalorder %s1085_s22, 1 }
  0x25   : > { %s206_s15 = sand.u32 1, %s1019_s20   ;;  %s745_s16 = smul.u32 1792, %s1023_s21 }
  0x26   : > { %p1139_p3 = por %p1311_p0, %p40_p12  ;;  %s744_s17 = smul.u32 112, %s206_s15 }
  0x27   : > { %s1148_s29 = scalar_lea.hbm %s1297_s0, %s745_s16  ;;  %p1150_p11 = pnand %p773_p2, %p42_p13 }
  0x28   : > { %s1312_s14 = scalar_select %p1139_p3, 1, 0 }
  0x29   : > { %s210_s6 = scalar_lea.vmem [#allocation2], %s744_s17  ;;  %s1156_s8 = scalar_lea.sflag [#allocation3], %s206_s15 }
  0x2a   : > { %s217_s7 = sshll.u32 %s210_s6, 4  ;;  %s897_s9 = scalar_lea.hbm %s1148_s29, 1792  ;;  %s1154_s7 = int_to_ptr.vmem [resolvable:$true] %s217_s7 }
  0x2b   : > { %p898_p5 = scmp.ne.s32.totalorder %s1148_s29, %s897_s9  ;;  %p899_p7 = pneg %p1150_p11 }
  0x2c   : > { %s902_s12 = scalar_lea.hbm %s1297_s0, 3584  ;;  %p903_p10 = scmp.lt.s32.totalorder %s1148_s29, %s1297_s0 }
  0x2d   : > { %p900_p9 = pnand %p899_p7, %p898_p5  ;;  %p904_p2 = scmp.lt.s32.totalorder %s902_s12, %s897_s9 }
  0x2f   : > { %p901_p12 = pneg %p900_p9  ;;  %p905_p13 = por %p904_p2, %p903_p10 }
  0x31   : > { %p906_p0 = pnand %p905_p13, %p901_p12 }
  0x33   : > { %909 = shalt.err (!%p906_p0)
}
  0x34   : > { %s910_s15 = scalar_lea.vmem %s1154_s7, 1792  ;;  %s1028_s17 = smov [#allocation2]  }
  0x35   : > { %p911_p1 = scmp.ne.s32.totalorder %s1154_s7, %s910_s15  ;;  %s915_s27 = sshll.u32 %s1028_s17, 4  ;;  %s916_s27 = int_to_ptr.vmem [resolvable:$false] %s915_s27 }
  0x36   : > { %s917_s6 = scalar_lea.vmem %s916_s27, 3584  ;;  %p918_p9 = scmp.lt.s32.totalorder %s1154_s7, %s916_s27 }
  0x37   : > { %p913_p6 = pnand %p911_p1, %p899_p7  ;;  %p919_p3 = scmp.lt.s32.totalorder %s917_s6, %s910_s15 }
  0x39   : > { %p914_p5 = pneg %p913_p6  ;;  %p920_p4 = por %p919_p3, %p918_p9 }
  0x3b   : > { %p921_p8 = pnand %p920_p4, %p914_p5 }
  0x3d   : > { %924 = shalt.err (!%p921_p8)
}
  0x3e   : > { %s1029_s9 = smov 128   ;;  %s1030_s10 = smov 8  }
  0x3f   : > { %764 = dma.hbm_to_vmem [thread:$0]  (!%p1150_p11), %s1148_s29, 1792, %s1154_s7, %s1156_s8, %s1029_s9, %s1029_s9, %s1030_s10  }
  0x40   : > { %p1314_p1 = scmp.ne.s32.totalorder %s1309_s26, 0 }
  0x41   : > { %s1180_s11 = sand.u32 (!%p1314_p1), 1, %s1015_s19   ;;  %p1315_p4 = scmp.ne.s32.totalorder (!%p1314_p1), %s1307_s24, 0 }
  0x42   : > { %237 = sbr.rel (%p1314_p1) target bundleno = 379 (0x17b), region = 36  ;;  %s240_s16 = scalar_lea.sflag (!%p1314_p1), [#allocation3], %s1180_s11 }
  0x43   : > { %s746_s12 = smul.u32 (!%p1314_p1), 112, %s1180_s11 }
  0x45   : > { %s1184_s23 = scalar_lea.vmem (!%p1314_p1), [#allocation2], %s746_s12 }
  0x47   : > { %994 = dma.done.wait (%p1315_p4), %s240_s16, 1792  }
  0x48   : > { %996 = vsyncadd (%p1315_p4), %s240_s16, 4294965504  ;;  %p1316_p6 = scmp.eq.s32.totalorder %s1085_s22, 0 }
  0x4a   : > { %998 = dma.done.wait (%p1316_p6), [#allocation6], 256   ;;  %p1317_p8 = pmov %p1316_p6 }
  0x4b   : > { %v1031_v0 = vmov 0   ;;  %v816_v1 = vld [vmem:[%s1184_s23 + $0x64] ss:$8 sps:$4 sm:$0xff]   ;;  %v818_v2 = vld [vmem:[%s1184_s23 + $0x60] ss:$8 sps:$4 sm:$0xff]   ;;  %vm412_vm0 = vcmask 916480  }
  0x4c   : > { %1000 = vsyncadd (%p1317_p8), [#allocation6], 4294967040  ;;  %451 = vmatprep.mubr.bf16.mxu0 %v1031_v0  ;;  %461 = vmatprep.mubr.bf16.mxu1 %v1031_v0  ;;  %v819_v3 = vld [vmem:[%s1184_s23 + $0x54] ss:$8 sps:$4 sm:$0xff]   ;;  %v821_v4 = vld [vmem:[%s1184_s23 + $0x50] ss:$8 sps:$4 sm:$0xff]  }
  0x4d   : > { %814 = vset.pattern.permute.xlu0 %v1031_v0  ;;  %815 = vset.pattern.permute.xlu1 %v1031_v0  ;;  %v822_v5 = vld [vmem:[%s1184_s23 + $0x44] ss:$8 sps:$4 sm:$0xff]   ;;  %v824_v6 = vld [vmem:[%s1184_s23 + $0x40] ss:$8 sps:$4 sm:$0xff]   ;;  %v825_v7 = vld [vmem:[%s1184_s23 + $0x34] ss:$8 sps:$4 sm:$0xff]  }
  0x4e   : > { %421 = vmatprep.subr.bf16.mxu0 %v816_v1  ;;  %730 = vmatprep.subr.bf16.mxu1 %v816_v1  ;;  %v827_v8 = vld [vmem:[%s1184_s23 + $0x30] ss:$8 sps:$4 sm:$0xff]   ;;  %v828_v10 = vld [vmem:[%s1184_s23 + $0x24] ss:$8 sps:$4 sm:$0xff]   ;;  %v830_v14 = vld [vmem:[%s1184_s23 + $0x20] ss:$8 sps:$4 sm:$0xff]  }
  0x4f   : > { %422 = vmatpush1.bf16.msra.mxu0 %v818_v2  ;;  %737 = vmatpush1.bf16.msra.mxu1 %v818_v2  ;;  %v308_v9 = vld [vmem:[%s1300_s3] sm:$0xff]  ;;  %v310_v11 = vld [vmem:[%s1300_s3 + $0x10] sm:$0xff]  ;;  %v309_v12 = vld [vmem:[%s1300_s3 + $0x8] sm:$0xff]  ;;  %p284_p3 = scmp.lt.s32.totalorder %s1085_s22, 1  ;;  %s691_s16 = sshll.u32 %s1180_s11, 4 }
  0x50   : > { %423 = vmatprep.subr.bf16.mxu0 %v819_v3  ;;  %731 = vmatprep.subr.bf16.mxu1 %v819_v3  ;;  %v311_v13 = vld [vmem:[%s1300_s3 + $0x18] sm:$0xff]  ;;  %v837_v19 = vld [vmem:[#allocation5] sm:$0xff]   ;;  %v838_v20 = vld [vmem:[#allocation5 + $0x8] sm:$0xff]   ;;  %s283_s24 = scalar_lea.vmem [#allocation8], %s691_s16  ;;  %s532_s8 = scalar_lea.sflag [#allocation9], %s1180_s11 }
  0x51   : > { %314 = vperm.xlu0 %814, %v308_v9   ;;  %324 = vperm.xlu1 %815, %v310_v11   ;;  %v831_v15 = vld [vmem:[%s1184_s23 + $0x14] ss:$8 sps:$4 sm:$0xff]   ;;  %v833_v16 = vld [vmem:[%s1184_s23 + $0x10] ss:$8 sps:$4 sm:$0xff]   ;;  %v834_v17 = vld [vmem:[%s1184_s23 + $0x4] ss:$8 sps:$4 sm:$0xff]  }
  0x52   : > { %v836_v18 = vld [vmem:[%s1184_s23] ss:$8 sps:$4 sm:$0xff]   ;;  %s285_s27 = scalar_select %p284_p3, %s1085_s22, 1 }
  0x53   : > { %424 = vmatpush1.bf16.msra.mxu0 %v821_v4  ;;  %738 = vmatpush1.bf16.msra.mxu1 %v821_v4  ;;  %s728_s23 = sshll.u32 %s1085_s22, 8  ;;  %s560_s26 = sshll.u32 %s283_s24, 4  ;;  %s1236_s26 = int_to_ptr.vmem [resolvable:$true] %s560_s26 }
  0x54   : > { %425 = vmatprep.subr.bf16.mxu0 %v822_v5  ;;  %732 = vmatprep.subr.bf16.mxu1 %v822_v5  ;;  %s727_s6 = sshll.u32 %s285_s27, 4  ;;  %s1234_s7 = scalar_lea.hbm %s1302_s5, %s728_s23 }
  0x55   : > { %319 = vperm.xlu0 %814, %v309_v12   ;;  %329 = vperm.xlu1 %815, %v311_v13   ;;  %s288_s12 = scalar_lea.vmem %s1298_s1, %s727_s6  ;;  %s925_s15 = scalar_lea.vmem %s1236_s26, 256 }
  0x56   : > { %v510_v59 = vld [vmem:[%s288_s12] sm:$0xff]  ;;  %v511_v63 = vld [vmem:[%s288_s12 + $0x8] sm:$0xff]  ;;  %p926_p11 = scmp.ne.s32.totalorder %s1236_s26, %s925_s15  ;;  %p1318_p7 = scmp.ne.s32.totalorder %s1312_s14, 0 }
  0x57   : > { %426 = vmatpush1.bf16.msra.mxu0 %v824_v6  ;;  %739 = vmatpush1.bf16.msra.mxu1 %v824_v6  ;;  %s1032_s17 = smov [#allocation8]  }
  0x58   : > { %427 = vmatprep.subr.bf16.mxu0 %v825_v7  ;;  %733 = vmatprep.subr.bf16.mxu1 %v825_v7  ;;  %p927_p12 = pnand %p926_p11, %p1318_p7  ;;  %s929_s27 = sshll.u32 %s1032_s17, 4  ;;  %s930_s27 = int_to_ptr.vmem [resolvable:$false] %s929_s27 }
  0x59   : > { %s931_s6 = scalar_lea.vmem %s930_s27, 512  ;;  %p932_p2 = scmp.lt.s32.totalorder %s1236_s26, %s930_s27 }
  0x5a   : > { %p928_p10 = pneg %p927_p12  ;;  %p933_p13 = scmp.lt.s32.totalorder %s931_s6, %s925_s15 }
  0x5b   : > { %428 = vmatpush1.bf16.msra.mxu0 %v827_v8  ;;  %740 = vmatpush1.bf16.msra.mxu1 %v827_v8 }
  0x5c   : > { %429 = vmatprep.subr.bf16.mxu0 %v828_v10  ;;  %734 = vmatprep.subr.bf16.mxu1 %v828_v10  ;;  %p934_p0 = por %p933_p13, %p932_p2 }
  0x5e   : > { %p935_p5 = pnand %p934_p0, %p928_p10 }
  0x5f   : > { %430 = vmatpush1.bf16.msra.mxu0 %v830_v14  ;;  %741 = vmatpush1.bf16.msra.mxu1 %v830_v14 }
  0x60   : > { %431 = vmatprep.subr.bf16.mxu0 %v831_v15  ;;  %735 = vmatprep.subr.bf16.mxu1 %v831_v15 }
  0x63   : > { %432 = vmatpush1.bf16.msra.mxu0 %v833_v16  ;;  %742 = vmatpush1.bf16.msra.mxu1 %v833_v16 }
  0x64   : > { %433 = vmatprep.subr.bf16.mxu0 %v834_v17  ;;  %736 = vmatprep.subr.bf16.mxu1 %v834_v17 }
  0x67   : > { %434 = vmatpush1.bf16.msra.mxu0 %v836_v18  ;;  %743 = vmatpush1.bf16.msra.mxu1 %v836_v18 }
  0x6a   : > { %711 = vmatmul.mubr.msk.bf16.vlgmr.msra.gmra.mxu0 %vm412_vm0, %v837_v19  ;;  %712 = vmatmul.mubr.msk.bf16.vlgmr.msra.gmra.mxu1 %vm412_vm0, %v838_v20 }
  0xcc   : > { %v315_v21 = vpop.permute.xlu0 %314  ;;  %v325_v36 = vpop.permute.xlu1 %324 }
  0xd0   : > { %v320_v27 = vpop.permute.xlu0 %319  ;;  %v330_v41 = vpop.permute.xlu1 %329 }
 0x12a   : > { %v453_v22 = vpop.f32.mrf.mxu0  ;;  %v463_v34 = vpop.f32.mrf.mxu1 }
 0x12b   : > { %v454_v23 = vadd.f32 %v453_v22, %v315_v21  ;;  %v464_v38 = vadd.f32 %v463_v34, %v325_v36 }
 0x12c   : > { %v455_v24 = vpop.f32.mrf.mxu0  ;;  %v465_v37 = vpop.f32.mrf.mxu1 }
 0x12d   : > { %v713_v25 = vmul.f32 -1.442695, %v454_v23  ;;  %v456_v26 = vadd.f32 %v455_v24, %v315_v21  ;;  %v466_v39 = vadd.f32 %v465_v37, %v325_v36  ;;  %v717_v42 = vmul.f32 -1.442695, %v464_v38 }
 0x12e   : > { %v457_v28 = vpop.f32.mrf.mxu0  ;;  %v467_v40 = vpop.f32.mrf.mxu1 }
 0x12f   : > { %839 = vpow2.f32 %v713_v25  ;;  %v714_v29 = vmul.f32 -1.442695, %v456_v26  ;;  %v458_v30 = vadd.f32 %v457_v28, %v320_v27  ;;  %v718_v43 = vmul.f32 -1.442695, %v466_v39 }
 0x130   : > { %v459_v31 = vpop.f32.mrf.mxu0  ;;  %v468_v45 = vadd.f32 %v467_v40, %v330_v41  ;;  %v469_v47 = vpop.f32.mrf.mxu1 }
 0x131   : > { %841 = vpow2.f32 %v714_v29  ;;  %v715_v32 = vmul.f32 -1.442695, %v458_v30  ;;  %v460_v33 = vadd.f32 %v459_v31, %v320_v27  ;;  %v470_v51 = vadd.f32 %v469_v47, %v330_v41 }
 0x133   : > { %843 = vpow2.f32 %v715_v32  ;;  %v716_v35 = vmul.f32 -1.442695, %v460_v33 }
 0x135   : > { %845 = vpow2.f32 %v716_v35 }
 0x136   : > { %847 = vpow2.f32 %v717_v42 }
 0x137   : > { %849 = vpow2.f32 %v718_v43 }
 0x138   : > { %851 = vtanh.f32 %v468_v45 }
 0x13c   : > { %v840_v44 = vpop.eup %839 }
 0x13d   : > { %v478_v46 = vadd.f32 1.0, %v840_v44 }
 0x13e   : > { %v842_v48 = vpop.eup %841 }
 0x13f   : > { %v479_v49 = vadd.f32 1.0, %v842_v48  ;;  %853 = vrcp.f32 %v478_v46 }
 0x140   : > { %v844_v50 = vpop.eup %843 }
 0x141   : > { %v490_v52 = vadd.f32 1.0, %v844_v50  ;;  %855 = vrcp.f32 %v479_v49 }
 0x142   : > { %v846_v53 = vpop.eup %845 }
 0x143   : > { %857 = vrcp.f32 %v490_v52  ;;  %v491_v54 = vadd.f32 1.0, %v846_v53  ;;  %v848_v55 = vpop.eup %847 }
 0x144   : > { %859 = vtanh.f32 %v470_v51  ;;  %v850_v56 = vpop.eup %849  ;;  %v502_v62 = vadd.f32 1.0, %v848_v55 }
 0x145   : > { %861 = vrcp.f32 %v491_v54  ;;  %v852_v57 = vpop.eup %851  ;;  %v503_v4 = vadd.f32 1.0, %v850_v56 }
 0x146   : > { %863 = vrcp.f32 %v502_v62 }
 0x14c   : > { %v854_v58 = vpop.eup %853 }
 0x14d   : > { %v514_v2 = vmul.f32 %v854_v58, %v852_v57 }
 0x14e   : > { %v856_v60 = vpop.eup %855 }
 0x150   : > { %v858_v61 = vpop.eup %857 }
 0x151   : > { %v860_v0 = vpop.eup %859  ;;  %v512_v1 = vmul.f32 %v858_v61, %v510_v59 }
 0x152   : > { %v862_v3 = vpop.eup %861  ;;  %v515_v7 = vmul.f32 %v860_v0, %v856_v60 }
 0x153   : > { %v516_v5 = vadd.f32 %v514_v2, %v512_v1  ;;  %v513_v6 = vmul.f32 %v862_v3, %v511_v63 }
 0x155   : > { %865 = vtanh.f32 %v516_v5  ;;  %v517_v8 = vadd.f32 %v515_v7, %v513_v6  ;;  %524 = vst [vmem:[%s283_s24] sm:$0xff] %v516_v5 }
 0x156   : > { %867 = vrcp.f32 %v503_v4 }
 0x157   : > { %869 = vtanh.f32 %v517_v8  ;;  %525 = vst [vmem:[%s283_s24 + $0x8] sm:$0xff] %v517_v8 }
 0x158   : > { %938 = shalt.err (!%p935_p5)
}
 0x159   : > { %s939_s9 = scalar_lea.hbm %s1234_s7, 256  ;;  %s943_s24 = scalar_lea.hbm %s1302_s5, 512 }
 0x15a   : > { %p940_p9 = scmp.ne.s32.totalorder %s1234_s7, %s939_s9  ;;  %p944_p6 = scmp.lt.s32.totalorder %s1234_s7, %s1302_s5 }
 0x15b   : > { %p945_p8 = scmp.lt.s32.totalorder %s943_s24, %s939_s9 }
 0x15c   : > { %p941_p1 = pnand %p940_p9, %p1318_p7 }
 0x15d   : > { %p946_p3 = por %p945_p8, %p944_p6 }
 0x15e   : > { %p942_p4 = pneg %p941_p1 }
 0x160   : > { %p947_p11 = pnand %p946_p3, %p942_p4 }
 0x162   : > { %950 = shalt.err (!%p947_p11)
}
 0x163   : > { %754 = dma.vmem_to_hbm [thread:$0]  (%p1318_p7), %s1236_s26, 256, %s1234_s7, %s532_s8   ;;  %v864_v9 = vpop.eup %863 }
 0x164   : > { %v866_v10 = vpop.eup %865  ;;  %s276_s15 = scalar_lea.vmem [#allocation7], %s691_s16  ;;  %s544_s9 = scalar_lea.hbm %s1301_s4, %s728_s23 }
 0x165   : > { %s546_s17 = sshll.u32 %s276_s15, 4  ;;  %v868_v11 = vpop.eup %867  ;;  %v520_v12 = vmul.f32 %v866_v10, %v864_v9  ;;  %s527_s10 = scalar_lea.sflag [#allocation4], %s1180_s11  ;;  %s547_s17 = int_to_ptr.vmem [resolvable:$true] %s546_s17 }
 0x166   : > { %v870_v13 = vpop.eup %869  ;;  %s951_s26 = scalar_lea.vmem %s547_s17, 256  ;;  %s1033_s16 = smov [#allocation7]  }
 0x167   : > { %v521_v14 = vmul.f32 %v870_v13, %v868_v11  ;;  %522 = vst [vmem:[%s276_s15] sm:$0xff] %v520_v12  ;;  %p952_p12 = scmp.ne.s32.totalorder %s547_s17, %s951_s26  ;;  %s955_s7 = sshll.u32 %s1033_s16, 4  ;;  %s956_s7 = int_to_ptr.vmem [resolvable:$false] %s955_s7 }
 0x168   : > { %s957_s8 = scalar_lea.vmem %s956_s7, 512  ;;  %p958_p13 = scmp.lt.s32.totalorder %s547_s17, %s956_s7 }
 0x169   : > { %523 = vst [vmem:[%s276_s15 + $0x8] sm:$0xff] %v521_v14  ;;  %p953_p10 = pnand %p952_p12, %p1318_p7  ;;  %p959_p0 = scmp.lt.s32.totalorder %s957_s8, %s951_s26 }
 0x16b   : > { %p954_p2 = pneg %p953_p10  ;;  %p960_p5 = por %p959_p0, %p958_p13 }
 0x16d   : > { %p961_p9 = pnand %p960_p5, %p954_p2 }
 0x16f   : > { %964 = shalt.err (!%p961_p9)
}
 0x170   : > { %s965_s22 = scalar_lea.hbm %s544_s9, 256  ;;  %s969_s12 = scalar_lea.hbm %s1301_s4, 512 }
 0x171   : > { %p966_p1 = scmp.ne.s32.totalorder %s544_s9, %s965_s22  ;;  %p970_p8 = scmp.lt.s32.totalorder %s544_s9, %s1301_s4 }
 0x172   : > { %p971_p3 = scmp.lt.s32.totalorder %s969_s12, %s965_s22 }
 0x173   : > { %p967_p4 = pnand %p966_p1, %p1318_p7 }
 0x174   : > { %p972_p11 = por %p971_p3, %p970_p8 }
 0x175   : > { %p968_p6 = pneg %p967_p4 }
 0x177   : > { %p973_p12 = pnand %p972_p11, %p968_p6 }
 0x179   : > { %976 = shalt.err (!%p973_p12)
}
 0x17a   : > { %753 = dma.vmem_to_hbm [thread:$0]  (%p1318_p7), %s547_s17, 256, %s544_s9, %s527_s10  }
 0x17b PF: > { %s572_s28 = sand.u32 1, %s1011_s18   ;;  %p1319_p10 = scmp.ne.s32.totalorder %s1308_s25, 0 }
 0x17c   : > { %p1320_p2 = scmp.ge.s32.totalorder %s1023_s21, 2  ;;  %s573_s15 = scalar_lea.sflag [#allocation4], %s572_s28 }
 0x17e   : > { %p766_p13 = pnand %p1320_p2, %p1319_p10 }
 0x180   : > { %p767_p0 = pneg %p766_p13 }
 0x182   : > { %1002 = dma.done.wait (%p767_p0), %s573_s15, 256  }
 0x183   : > { %1004 = vsyncadd (%p767_p0), %s573_s15, 4294967040  ;;  %s582_s27 = scalar_lea.sflag [#allocation9], %s572_s28 }
 0x184   : > { %1006 = dma.done.wait (%p767_p0), %s582_s27, 256  }
 0x185   : > { %1008 = vsyncadd (%p767_p0), %s582_s27, 4294967040  ;;  %p23_p7 = scmp.ge.s32.totalorder %s1118_s30, 4   ;;  %s1321_s18 = smov %s1015_s19 }
 0x186   : > { %s1322_s19 = smov %s1019_s20  ;;  %s1323_s20 = smov %s1135_s13 }
 0x187   : > { %s1324_s21 = smov %s1118_s30  ;;  %25 = sbr.rel (!%p23_p7) target bundleno = 8 (0x8), region = 105 }
 0x18c   :  { %587 = vsyncpa [#allocation3], 1 }
 0x18d   :  { %589 = vsyncpa [#allocation3 + $0x1], 1 }
 0x18e   :  { %590 = vsyncpa [#allocation6], 1 }
 0x18f   :  { %591 = vsyncpa [#allocation4], 1 }
 0x190   :  { %593 = vsyncpa [#allocation4 + $0x1], 1 }
 0x191   :  { %594 = vsyncpa [#allocation9], 1 }
 0x192   :  { %596 = vsyncpa [#allocation9 + $0x1], 1 }

</bundles_post_ra>
